<compile_context>
chip_gen: v7x
topology: tpu7x:2x2x1
jax: 0.10.0
libtpu: 0.0.40
codegen_flags: <defaults>
</compile_context>

<pallas_src>
import functools

import jax
import jax.numpy as jnp
from jax import lax
from jax.experimental import pallas as pl
from jax.experimental.pallas import tpu as pltpu


def _ru(x, m):
    return ((x + m - 1) // m) * m


def _make_masks(N, H, W, Lp):
    """(16, Lp) f32 tap masks, built on the host, DMA'd once per call.

    Row t = kh*3+kw (t < 9) is 1 where tap (kh-1, kw-1) of that output lane
    reads a real pixel (inside the image AND inside the un-padded lane range).
    Row 4 (center tap) is therefore exactly the lane-validity mask.
    """
    L = N * H * W
    idx = jnp.arange(Lp, dtype=jnp.int32)
    hh = (idx // W) % H
    ww = idx % W
    valid = idx < L
    rows = []
    for kh in range(3):
        for kw in range(3):
            dh, dw = kh - 1, kw - 1
            ok = (valid & (hh + dh >= 0) & (hh + dh < H)
                  & (ww + dw >= 0) & (ww + dw < W))
            rows.append(ok.astype(jnp.float32))
    m = jnp.stack(rows, axis=0)                   # (9, Lp)
    return jnp.pad(m, ((0, 16 - 9), (0, 0)))      # sublane-align to 16 rows


def _pack_params(params, cin0, cout, cmax):
    """Stack per-layer weights / BN params along a leading layer axis.

    Conv biases are intentionally dropped: both convs feed straight into a
    training-mode BatchNorm, whose mean subtraction cancels any per-channel
    constant, so the biases have zero effect on the output.

    Returns:
      w3s: (L, 9*cpo, cmax)  rows [t*cpo:(t+1)*cpo] = 3x3 tap t weights.
      w1s: (L, cpo, cmax)    1x1 shortcut weights.
      bns: (L, cpo, 6)       cols [g_sc, b_sc, g_cv, b_cv, g_bn, b_bn]
                             (gamma=beta=0 on padded channels keeps them 0).
    """
    cpo = _ru(cout, 8)
    w3s, w1s, bns = [], [], []
    cin = cin0
    for p in params:
        wc = jnp.transpose(p["w_cv"], (2, 3, 0, 1)).reshape(9, cout, cin)
        w3 = jnp.zeros((9, cpo, cmax), jnp.float32).at[:, :cout, :cin].set(wc)
        w1 = jnp.zeros((cpo, cmax), jnp.float32).at[:cout, :cin].set(
            p["w_sc"][:, :, 0, 0])

        def padv(v):
            return jnp.zeros((cpo,), jnp.float32).at[:cout].set(v)

        bn = jnp.stack([padv(p["g_sc"]), padv(p["beta_sc"]),
                        padv(p["g_cv"]), padv(p["beta_cv"]),
                        padv(p["g_bn"]), padv(p["beta_bn"])], axis=1)
        w3s.append(w3.reshape(9 * cpo, cmax))
        w1s.append(w1)
        bns.append(bn)
        cin = cout
    return jnp.stack(w3s), jnp.stack(w1s), jnp.stack(bns)


def _respath_kernel(x_ref, m_ref, w3_ref, w1_ref, bn_ref, o_ref, act_ref,
                    *, W, cpo, inv_cnt, eps, has_pad):
    layer = pl.program_id(0)
    last = pl.num_programs(0) - 1

    @pl.when(layer == 0)
    def _():
        act_ref[...] = x_ref[...]            # single input DMA for all layers

    x = act_ref[...]                         # (cmax, Lp) f32, lane-dense
    Lp = x.shape[1]
    lanemask = m_ref[4:5, :]                 # lane validity (all ones if no pad)

    # --- convolutions: 9 masked lane-rolls, per-tap MXU accumulation -------
    xc = x * lanemask if has_pad else x
    sc = jnp.dot(w1_ref[0], xc, preferred_element_type=jnp.float32)     # 1x1
    cv = jnp.dot(w3_ref[0, 4 * cpo:5 * cpo, :], xc,
                 preferred_element_type=jnp.float32)                    # 3x3 center
    for kh in range(3):
        for kw in range(3):
            t = kh * 3 + kw
            if t == 4:
                continue
            d = (kh - 1) * W + (kw - 1)      # flat-index offset of this tap
            v = pltpu.roll(x, (-d) % Lp, 1) * m_ref[t:t + 1, :]
            cv = cv + jnp.dot(w3_ref[0, t * cpo:(t + 1) * cpo, :], v,
                              preferred_element_type=jnp.float32)

    # --- training-mode BatchNorm folded to ONE affine pass ------------------
    # TODO(synk): the two cross-lane sums could be offloaded to the idle MXU
    # (dot with a ones column) if the XLU ever becomes the bottleneck.
    def bn(v, col, relu):
        g = bn_ref[0, :, col:col + 1]                       # (cpo, 1)
        b = bn_ref[0, :, col + 1:col + 2]
        s1 = jnp.sum(v, axis=1, keepdims=True) * inv_cnt    # E[v]
        s2 = jnp.sum(v * v, axis=1, keepdims=True) * inv_cnt  # E[v^2]
        a = g * lax.rsqrt(s2 - s1 * s1 + eps)               # biased variance
        c = b - s1 * a
        y = v * a + c
        if relu:
            y = jnp.maximum(y, 0.0)
        if has_pad:
            y = y * lanemask     # keep padded lanes exactly 0 for later stats
        return y

    sc = bn(sc, 0, relu=False)               # shortcut BN (no relu)
    y = bn(cv, 2, relu=True)                 # main conv BN + relu
    y = bn(y, 4, relu=True)                  # bns[i] + relu (pre-add)
    y = y + sc
    y = bn(y, 4, relu=True)                  # bns[i] + relu (post-add)

    @pl.when(layer < last)
    def _():
        act_ref[0:cpo, :] = y                # carry to next layer in VMEM

    @pl.when(layer == last)
    def _():
        o_ref[...] = y                       # single output DMA at the end


def respath_forward(x_nchw, params):
    """x_nchw: (N, Cin, H, W) f32; params: list of per-layer dicts (OIHW)."""
    N, cin0, H, W = x_nchw.shape
    num_out = params[0]["w_cv"].shape[0]
    num_layers = len(params)
    L = N * H * W
    Lp = _ru(L, 128)                         # lane-dense stores
    has_pad = Lp != L
    cpi0, cpo = _ru(cin0, 8), _ru(num_out, 8)
    cmax = max(cpi0, cpo)

    # channels-first, flattened NHW on lanes; pad channels to /8, lanes to /128
    x = jnp.transpose(x_nchw, (1, 0, 2, 3)).reshape(cin0, L)
    x = jnp.pad(x, ((0, cmax - cin0), (0, Lp - L)))

    masks = _make_masks(N, H, W, Lp)
    w3s, w1s, bns = _pack_params(params, cin0, num_out, cmax)

    kernel = functools.partial(_respath_kernel, W=W, cpo=cpo,
                               inv_cnt=1.0 / float(L), eps=1e-5,
                               has_pad=has_pad)

    flops = int(num_layers * (20 * cpo * cmax * Lp + 40 * cpo * Lp
                              + 9 * cmax * Lp))
    bytes_accessed = int(4 * ((cmax + cpo + 16) * Lp
                              + w3s.size + w1s.size + bns.size))
    est_vmem = 4 * Lp * (3 * cmax + 32 + 12 * cpo) + 8 * (w3s.size + w1s.size
                                                          + bns.size)
    vmem_limit = int(min(64 * 2 ** 20, max(32 * 2 ** 20, 6 * est_vmem)))

    out = pl.pallas_call(
        kernel,
        out_shape=jax.ShapeDtypeStruct((cpo, Lp), jnp.float32),
        grid=(num_layers,),
        in_specs=[
            pl.BlockSpec((cmax, Lp), lambda l: (0, 0)),           # input (once)
            pl.BlockSpec((16, Lp), lambda l: (0, 0)),             # masks (once)
            pl.BlockSpec((1, 9 * cpo, cmax), lambda l: (l, 0, 0)),  # 3x3 W
            pl.BlockSpec((1, cpo, cmax), lambda l: (l, 0, 0)),      # 1x1 W
            pl.BlockSpec((1, cpo, 6), lambda l: (l, 0, 0)),         # BN params
        ],
        out_specs=pl.BlockSpec((cpo, Lp), lambda l: (0, 0)),
        scratch_shapes=[pltpu.VMEM((cmax, Lp), jnp.float32)],      # layer carry
        compiler_params=pltpu.CompilerParams(
            dimension_semantics=("arbitrary",),
            vmem_limit_bytes=vmem_limit),
        cost_estimate=pl.CostEstimate(flops=flops,
                                      transcendentals=int(num_layers * 4 * cpo),
                                      bytes_accessed=bytes_accessed),
    )(x, masks, w3s, w1s, bns)

    out = out[:num_out, :L].reshape(num_out, N, H, W)
    return jnp.transpose(out, (1, 0, 2, 3))


# ----------------------------------------------------------------------------
# Pure-JAX reference (in-script numerical check against the PyTorch spec)
# ----------------------------------------------------------------------------
def _bn_ref(v, g, b, eps=1e-5):
    mean = jnp.mean(v, axis=(0, 2, 3), keepdims=True)
    var = jnp.mean((v - mean) ** 2, axis=(0, 2, 3), keepdims=True)
    return ((v - mean) * lax.rsqrt(var + eps) * g[None, :, None, None]
            + b[None, :, None, None])


def respath_reference(x, params):
    dn = ("NCHW", "OIHW", "NCHW")
    for p in params:
        sc = lax.conv_general_dilated(x, p["w_sc"], (1, 1), "SAME",
                                      dimension_numbers=dn,
                                      precision=lax.Precision.HIGHEST)
        sc = sc + p["b_sc"][None, :, None, None]
        sc = _bn_ref(sc, p["g_sc"], p["beta_sc"])
        y = lax.conv_general_dilated(x, p["w_cv"], (1, 1), "SAME",
                                     dimension_numbers=dn,
                                     precision=lax.Precision.HIGHEST)
        y = y + p["b_cv"][None, :, None, None]
        y = jnp.maximum(_bn_ref(y, p["g_cv"], p["beta_cv"]), 0.0)
        y = jnp.maximum(_bn_ref(y, p["g_bn"], p["beta_bn"]), 0.0)
        y = y + sc
        y = jnp.maximum(_bn_ref(y, p["g_bn"], p["beta_bn"]), 0.0)
        x = y
    return x


def init_respath_params(key, num_in, num_out, length):
    params = []
    for i in range(length):
        cin = num_in if i == 0 else num_out
        key, k1, k2, k3, k4, k5, k6 = jax.random.split(key, 7)
        params.append(dict(
            w_sc=0.1 * jax.random.normal(k1, (num_out, cin, 1, 1), jnp.float32),
            b_sc=0.1 * jax.random.normal(k2, (num_out,), jnp.float32),
            w_cv=0.1 * jax.random.normal(k3, (num_out, cin, 3, 3), jnp.float32),
            b_cv=0.1 * jax.random.normal(k4, (num_out,), jnp.float32),
            # PyTorch BatchNorm2d defaults are weight=1, bias=0; perturb some
            # so the numerical self-check exercises them.
            g_sc=1.0 + 0.1 * jax.random.normal(k5, (num_out,), jnp.float32),
            beta_sc=0.1 * jax.random.normal(k6, (num_out,), jnp.float32),
            g_cv=jnp.ones((num_out,), jnp.float32),
            beta_cv=jnp.zeros((num_out,), jnp.float32),
            g_bn=jnp.ones((num_out,), jnp.float32),
            beta_bn=jnp.zeros((num_out,), jnp.float32),
        ))
    return params


if __name__ == "__main__":
    # Primary check: N*H*W already a multiple of 128 (no lane padding).
    N, C_IN, C_OUT, H, W, LENGTH = 2, 4, 8, 16, 16, 2
    x = jax.random.normal(jax.random.PRNGKey(0), (N, C_IN, H, W), jnp.float32)
    params = init_respath_params(jax.random.PRNGKey(1), C_IN, C_OUT, LENGTH)

    out = jax.block_until_ready(jax.jit(respath_forward)(x, params))
    assert out.shape == (N, C_OUT, H, W), out.shape
    assert bool(jnp.all(jnp.isfinite(out)))
    ref = jax.block_until_ready(respath_reference(x, params))
    err = float(jnp.max(jnp.abs(out - ref)))
    assert err < 2e-3, f"primary max abs err vs reference: {err}"

    # Secondary check: exercises lane padding (L % 128 != 0) and C_IN > C_OUT.
    N2, C_IN2, C_OUT2, H2, W2, LEN2 = 1, 12, 8, 5, 7, 2
    x2 = jax.random.normal(jax.random.PRNGKey(2), (N2, C_IN2, H2, W2),
                           jnp.float32)
    params2 = init_respath_params(jax.random.PRNGKey(3), C_IN2, C_OUT2, LEN2)
    out2 = jax.block_until_ready(jax.jit(respath_forward)(x2, params2))
    ref2 = jax.block_until_ready(respath_reference(x2, params2))
    err2 = float(jnp.max(jnp.abs(out2 - ref2)))
    assert err2 < 2e-3, f"padded-L max abs err vs reference: {err2}"

    print("KERNEL_OK")
</pallas_src>

<mosaic_0001>
module attributes {stable_mosaic.version = 11 : i64} {
  func.func @_respath_kernel(%arg0: i32, %arg1: memref<8x512xf32, #tpu.memory_space<vmem>>, %arg2: memref<16x512xf32, #tpu.memory_space<vmem>>, %arg3: memref<1x72x8xf32, #tpu.memory_space<vmem>>, %arg4: memref<1x8x8xf32, #tpu.memory_space<vmem>>, %arg5: memref<1x8x6xf32, #tpu.memory_space<vmem>>, %arg6: memref<8x512xf32, #tpu.memory_space<vmem>>, %arg7: memref<8x512xf32, #tpu.memory_space<vmem>>) attributes {dimension_semantics = [#tpu.dimension_semantics<arbitrary>], iteration_bounds = array<i64: 2>, scalar_prefetch = 0 : i64, scratch_operands = 1 : i64, tpu.core_type = #tpu.core_type<tc>, window_params = [{pipeline_mode = #tpu.pipeline_mode<synchronous>, transform_indices = @transform_0, window_bounds = array<i64: 8, 512>}, {pipeline_mode = #tpu.pipeline_mode<synchronous>, transform_indices = @transform_1, window_bounds = array<i64: 16, 512>}, {transform_indices = @transform_2, window_bounds = array<i64: 1, 72, 8>}, {transform_indices = @transform_3, window_bounds = array<i64: 1, 8, 8>}, {transform_indices = @transform_4, window_bounds = array<i64: 1, 8, 6>}, {pipeline_mode = #tpu.pipeline_mode<synchronous>, transform_indices = @transform_5, window_bounds = array<i64: 8, 512>}]} {
    %c0_i32 = arith.constant 0 : i32
    %0 = arith.cmpi eq, %arg0, %c0_i32 : i32
    %1 = arith.extui %0 : i1 to i32
    %c0_i32_0 = arith.constant 0 : i32
    %2 = arith.cmpi ne, %1, %c0_i32_0 : i32
    scf.if %2 {
      %c0_93 = arith.constant 0 : index
      %c0_94 = arith.constant 0 : index
      %187 = vector.load %arg1[%c0_93, %c0_94] : memref<8x512xf32, #tpu.memory_space<vmem>>, vector<8x512xf32>
      %c0_95 = arith.constant 0 : index
      %c0_96 = arith.constant 0 : index
      %188 = vector.load %arg7[%c0_95, %c0_96] : memref<8x512xf32, #tpu.memory_space<vmem>>, vector<8x512xf32>
      tpu.vector_store %arg7[%c0_95, %c0_96], %187 {strides = array<i32>} : memref<8x512xf32, #tpu.memory_space<vmem>>, vector<8x512xf32>,
    } else {
    }
    %c0 = arith.constant 0 : index
    %c0_1 = arith.constant 0 : index
    %3 = vector.load %arg7[%c0, %c0_1] : memref<8x512xf32, #tpu.memory_space<vmem>>, vector<8x512xf32>
    %c0_2 = arith.constant 0 : index
    %c0_3 = arith.constant 0 : index
    %c0_4 = arith.constant 0 : index
    %4 = vector.load %arg4[%c0_2, %c0_3, %c0_4] : memref<1x8x8xf32, #tpu.memory_space<vmem>>, vector<1x8x8xf32>
    %5 = vector.shape_cast %4 : vector<1x8x8xf32> to vector<8x8xf32>
    %cst = arith.constant dense<0.000000e+00> : vector<8x512xf32>
    %6 = tpu.matmul %5, %3, %cst {dimension_numbers = #tpu.dot_dimension_numbers<[1], [0], [0], [1], [0, 0, 1, 1], [], []>} : vector<8x8xf32>, vector<8x512xf32>, vector<8x512xf32> -> vector<8x512xf32>
    %c0_5 = arith.constant 0 : index
    %c32 = arith.constant 32 : index
    %c0_6 = arith.constant 0 : index
    %7 = vector.load %arg3[%c0_5, %c32, %c0_6] : memref<1x72x8xf32, #tpu.memory_space<vmem>>, vector<1x8x8xf32>
    %8 = vector.shape_cast %7 : vector<1x8x8xf32> to vector<8x8xf32>
    %cst_7 = arith.constant dense<0.000000e+00> : vector<8x512xf32>
    %9 = tpu.matmul %8, %3, %cst_7 {dimension_numbers = #tpu.dot_dimension_numbers<[1], [0], [0], [1], [0, 0, 1, 1], [], []>} : vector<8x8xf32>, vector<8x512xf32>, vector<8x512xf32> -> vector<8x512xf32>
    %c17_i32 = arith.constant 17 : i32
    %10 = tpu.dynamic_rotate %3 by %c17_i32 dim 1 : vector<8x512xf32>, i32 -> vector<8x512xf32>
    %c0_8 = arith.constant 0 : index
    %c0_9 = arith.constant 0 : index
    %11 = vector.load %arg2[%c0_8, %c0_9] : memref<16x512xf32, #tpu.memory_space<vmem>>, vector<1x512xf32>
    %12 = vector.broadcast %11 : vector<1x512xf32> to vector<8x512xf32>
    %13 = arith.mulf %10, %12 : vector<8x512xf32>
    %c0_10 = arith.constant 0 : index
    %c0_11 = arith.constant 0 : index
    %c0_12 = arith.constant 0 : index
    %14 = vector.load %arg3[%c0_10, %c0_11, %c0_12] : memref<1x72x8xf32, #tpu.memory_space<vmem>>, vector<1x8x8xf32>
    %15 = vector.shape_cast %14 : vector<1x8x8xf32> to vector<8x8xf32>
    %cst_13 = arith.constant dense<0.000000e+00> : vector<8x512xf32>
    %16 = tpu.matmul %15, %13, %cst_13 {dimension_numbers = #tpu.dot_dimension_numbers<[1], [0], [0], [1], [0, 0, 1, 1], [], []>} : vector<8x8xf32>, vector<8x512xf32>, vector<8x512xf32> -> vector<8x512xf32>
    %17 = arith.addf %9, %16 : vector<8x512xf32>
    %c16_i32 = arith.constant 16 : i32
    %18 = tpu.dynamic_rotate %3 by %c16_i32 dim 1 : vector<8x512xf32>, i32 -> vector<8x512xf32>
    %c1 = arith.constant 1 : index
    %c0_14 = arith.constant 0 : index
    %19 = vector.load %arg2[%c1, %c0_14] : memref<16x512xf32, #tpu.memory_space<vmem>>, vector<1x512xf32>
    %20 = vector.broadcast %19 : vector<1x512xf32> to vector<8x512xf32>
    %21 = arith.mulf %18, %20 : vector<8x512xf32>
    %c0_15 = arith.constant 0 : index
    %c8 = arith.constant 8 : index
    %c0_16 = arith.constant 0 : index
    %22 = vector.load %arg3[%c0_15, %c8, %c0_16] : memref<1x72x8xf32, #tpu.memory_space<vmem>>, vector<1x8x8xf32>
    %23 = vector.shape_cast %22 : vector<1x8x8xf32> to vector<8x8xf32>
    %cst_17 = arith.constant dense<0.000000e+00> : vector<8x512xf32>
    %24 = tpu.matmul %23, %21, %cst_17 {dimension_numbers = #tpu.dot_dimension_numbers<[1], [0], [0], [1], [0, 0, 1, 1], [], []>} : vector<8x8xf32>, vector<8x512xf32>, vector<8x512xf32> -> vector<8x512xf32>
    %25 = arith.addf %17, %24 : vector<8x512xf32>
    %c15_i32 = arith.constant 15 : i32
    %26 = tpu.dynamic_rotate %3 by %c15_i32 dim 1 : vector<8x512xf32>, i32 -> vector<8x512xf32>
    %c2 = arith.constant 2 : index
    %c0_18 = arith.constant 0 : index
    %27 = vector.load %arg2[%c2, %c0_18] : memref<16x512xf32, #tpu.memory_space<vmem>>, vector<1x512xf32>
    %28 = vector.broadcast %27 : vector<1x512xf32> to vector<8x512xf32>
    %29 = arith.mulf %26, %28 : vector<8x512xf32>
    %c0_19 = arith.constant 0 : index
    %c16 = arith.constant 16 : index
    %c0_20 = arith.constant 0 : index
    %30 = vector.load %arg3[%c0_19, %c16, %c0_20] : memref<1x72x8xf32, #tpu.memory_space<vmem>>, vector<1x8x8xf32>
    %31 = vector.shape_cast %30 : vector<1x8x8xf32> to vector<8x8xf32>
    %cst_21 = arith.constant dense<0.000000e+00> : vector<8x512xf32>
    %32 = tpu.matmul %31, %29, %cst_21 {dimension_numbers = #tpu.dot_dimension_numbers<[1], [0], [0], [1], [0, 0, 1, 1], [], []>} : vector<8x8xf32>, vector<8x512xf32>, vector<8x512xf32> -> vector<8x512xf32>
    %33 = arith.addf %25, %32 : vector<8x512xf32>
    %c1_i32 = arith.constant 1 : i32
    %34 = tpu.dynamic_rotate %3 by %c1_i32 dim 1 : vector<8x512xf32>, i32 -> vector<8x512xf32>
    %c3 = arith.constant 3 : index
    %c0_22 = arith.constant 0 : index
    %35 = vector.load %arg2[%c3, %c0_22] : memref<16x512xf32, #tpu.memory_space<vmem>>, vector<1x512xf32>
    %36 = vector.broadcast %35 : vector<1x512xf32> to vector<8x512xf32>
    %37 = arith.mulf %34, %36 : vector<8x512xf32>
    %c0_23 = arith.constant 0 : index
    %c24 = arith.constant 24 : index
    %c0_24 = arith.constant 0 : index
    %38 = vector.load %arg3[%c0_23, %c24, %c0_24] : memref<1x72x8xf32, #tpu.memory_space<vmem>>, vector<1x8x8xf32>
    %39 = vector.shape_cast %38 : vector<1x8x8xf32> to vector<8x8xf32>
    %cst_25 = arith.constant dense<0.000000e+00> : vector<8x512xf32>
    %40 = tpu.matmul %39, %37, %cst_25 {dimension_numbers = #tpu.dot_dimension_numbers<[1], [0], [0], [1], [0, 0, 1, 1], [], []>} : vector<8x8xf32>, vector<8x512xf32>, vector<8x512xf32> -> vector<8x512xf32>
    %41 = arith.addf %33, %40 : vector<8x512xf32>
    %c511_i32 = arith.constant 511 : i32
    %42 = tpu.dynamic_rotate %3 by %c511_i32 dim 1 : vector<8x512xf32>, i32 -> vector<8x512xf32>
    %c5 = arith.constant 5 : index
    %c0_26 = arith.constant 0 : index
    %43 = vector.load %arg2[%c5, %c0_26] : memref<16x512xf32, #tpu.memory_space<vmem>>, vector<1x512xf32>
    %44 = vector.broadcast %43 : vector<1x512xf32> to vector<8x512xf32>
    %45 = arith.mulf %42, %44 : vector<8x512xf32>
    %c0_27 = arith.constant 0 : index
    %c40 = arith.constant 40 : index
    %c0_28 = arith.constant 0 : index
    %46 = vector.load %arg3[%c0_27, %c40, %c0_28] : memref<1x72x8xf32, #tpu.memory_space<vmem>>, vector<1x8x8xf32>
    %47 = vector.shape_cast %46 : vector<1x8x8xf32> to vector<8x8xf32>
    %cst_29 = arith.constant dense<0.000000e+00> : vector<8x512xf32>
    %48 = tpu.matmul %47, %45, %cst_29 {dimension_numbers = #tpu.dot_dimension_numbers<[1], [0], [0], [1], [0, 0, 1, 1], [], []>} : vector<8x8xf32>, vector<8x512xf32>, vector<8x512xf32> -> vector<8x512xf32>
    %49 = arith.addf %41, %48 : vector<8x512xf32>
    %c497_i32 = arith.constant 497 : i32
    %50 = tpu.dynamic_rotate %3 by %c497_i32 dim 1 : vector<8x512xf32>, i32 -> vector<8x512xf32>
    %c6 = arith.constant 6 : index
    %c0_30 = arith.constant 0 : index
    %51 = vector.load %arg2[%c6, %c0_30] : memref<16x512xf32, #tpu.memory_space<vmem>>, vector<1x512xf32>
    %52 = vector.broadcast %51 : vector<1x512xf32> to vector<8x512xf32>
    %53 = arith.mulf %50, %52 : vector<8x512xf32>
    %c0_31 = arith.constant 0 : index
    %c48 = arith.constant 48 : index
    %c0_32 = arith.constant 0 : index
    %54 = vector.load %arg3[%c0_31, %c48, %c0_32] : memref<1x72x8xf32, #tpu.memory_space<vmem>>, vector<1x8x8xf32>
    %55 = vector.shape_cast %54 : vector<1x8x8xf32> to vector<8x8xf32>
    %cst_33 = arith.constant dense<0.000000e+00> : vector<8x512xf32>
    %56 = tpu.matmul %55, %53, %cst_33 {dimension_numbers = #tpu.dot_dimension_numbers<[1], [0], [0], [1], [0, 0, 1, 1], [], []>} : vector<8x8xf32>, vector<8x512xf32>, vector<8x512xf32> -> vector<8x512xf32>
    %57 = arith.addf %49, %56 : vector<8x512xf32>
    %c496_i32 = arith.constant 496 : i32
    %58 = tpu.dynamic_rotate %3 by %c496_i32 dim 1 : vector<8x512xf32>, i32 -> vector<8x512xf32>
    %c7 = arith.constant 7 : index
    %c0_34 = arith.constant 0 : index
    %59 = vector.load %arg2[%c7, %c0_34] : memref<16x512xf32, #tpu.memory_space<vmem>>, vector<1x512xf32>
    %60 = vector.broadcast %59 : vector<1x512xf32> to vector<8x512xf32>
    %61 = arith.mulf %58, %60 : vector<8x512xf32>
    %c0_35 = arith.constant 0 : index
    %c56 = arith.constant 56 : index
    %c0_36 = arith.constant 0 : index
    %62 = vector.load %arg3[%c0_35, %c56, %c0_36] : memref<1x72x8xf32, #tpu.memory_space<vmem>>, vector<1x8x8xf32>
    %63 = vector.shape_cast %62 : vector<1x8x8xf32> to vector<8x8xf32>
    %cst_37 = arith.constant dense<0.000000e+00> : vector<8x512xf32>
    %64 = tpu.matmul %63, %61, %cst_37 {dimension_numbers = #tpu.dot_dimension_numbers<[1], [0], [0], [1], [0, 0, 1, 1], [], []>} : vector<8x8xf32>, vector<8x512xf32>, vector<8x512xf32> -> vector<8x512xf32>
    %65 = arith.addf %57, %64 : vector<8x512xf32>
    %c495_i32 = arith.constant 495 : i32
    %66 = tpu.dynamic_rotate %3 by %c495_i32 dim 1 : vector<8x512xf32>, i32 -> vector<8x512xf32>
    %c8_38 = arith.constant 8 : index
    %c0_39 = arith.constant 0 : index
    %67 = vector.load %arg2[%c8_38, %c0_39] : memref<16x512xf32, #tpu.memory_space<vmem>>, vector<1x512xf32>
    %68 = vector.broadcast %67 : vector<1x512xf32> to vector<8x512xf32>
    %69 = arith.mulf %66, %68 : vector<8x512xf32>
    %c0_40 = arith.constant 0 : index
    %c64 = arith.constant 64 : index
    %c0_41 = arith.constant 0 : index
    %70 = vector.load %arg3[%c0_40, %c64, %c0_41] : memref<1x72x8xf32, #tpu.memory_space<vmem>>, vector<1x8x8xf32>
    %71 = vector.shape_cast %70 : vector<1x8x8xf32> to vector<8x8xf32>
    %cst_42 = arith.constant dense<0.000000e+00> : vector<8x512xf32>
    %72 = tpu.matmul %71, %69, %cst_42 {dimension_numbers = #tpu.dot_dimension_numbers<[1], [0], [0], [1], [0, 0, 1, 1], [], []>} : vector<8x8xf32>, vector<8x512xf32>, vector<8x512xf32> -> vector<8x512xf32>
    %73 = arith.addf %65, %72 : vector<8x512xf32>
    %c0_43 = arith.constant 0 : index
    %c0_44 = arith.constant 0 : index
    %c0_45 = arith.constant 0 : index
    %74 = vector.load %arg5[%c0_43, %c0_44, %c0_45] : memref<1x8x6xf32, #tpu.memory_space<vmem>>, vector<1x8x1xf32>
    %75 = vector.shape_cast %74 : vector<1x8x1xf32> to vector<8x1xf32>
    %c0_46 = arith.constant 0 : index
    %c0_47 = arith.constant 0 : index
    %c1_48 = arith.constant 1 : index
    %76 = vector.load %arg5[%c0_46, %c0_47, %c1_48] : memref<1x8x6xf32, #tpu.memory_space<vmem>>, vector<1x8x1xf32>
    %77 = vector.shape_cast %76 : vector<1x8x1xf32> to vector<8x1xf32>
    %cst_49 = arith.constant dense<0.000000e+00> : vector<8xf32>
    %78 = vector.multi_reduction <add>, %6, %cst_49 [1] : vector<8x512xf32> to vector<8xf32>
    %79 = vector.shape_cast %78 : vector<8xf32> to vector<8x1xf32>
    %cst_50 = arith.constant 0.001953125 : f32
    %80 = vector.broadcast %cst_50 : f32 to vector<8x1xf32>
    %81 = arith.mulf %79, %80 : vector<8x1xf32>
    %82 = arith.mulf %6, %6 : vector<8x512xf32>
    %cst_51 = arith.constant dense<0.000000e+00> : vector<8xf32>
    %83 = vector.multi_reduction <add>, %82, %cst_51 [1] : vector<8x512xf32> to vector<8xf32>
    %84 = vector.shape_cast %83 : vector<8xf32> to vector<8x1xf32>
    %cst_52 = arith.constant 0.001953125 : f32
    %85 = vector.broadcast %cst_52 : f32 to vector<8x1xf32>
    %86 = arith.mulf %84, %85 : vector<8x1xf32>
    %87 = arith.mulf %81, %81 : vector<8x1xf32>
    %88 = arith.subf %86, %87 : vector<8x1xf32>
    %cst_53 = arith.constant 9.99999974E-6 : f32
    %89 = vector.broadcast %cst_53 : f32 to vector<8x1xf32>
    %90 = arith.addf %88, %89 : vector<8x1xf32>
    %91 = math.rsqrt %90 : vector<8x1xf32>
    %92 = arith.mulf %75, %91 : vector<8x1xf32>
    %93 = arith.mulf %81, %92 : vector<8x1xf32>
    %94 = arith.subf %77, %93 : vector<8x1xf32>
    %95 = vector.broadcast %92 : vector<8x1xf32> to vector<8x512xf32>
    %96 = arith.mulf %6, %95 : vector<8x512xf32>
    %97 = vector.broadcast %94 : vector<8x1xf32> to vector<8x512xf32>
    %98 = arith.addf %96, %97 : vector<8x512xf32>
    %c0_54 = arith.constant 0 : index
    %c0_55 = arith.constant 0 : index
    %c2_56 = arith.constant 2 : index
    %99 = vector.load %arg5[%c0_54, %c0_55, %c2_56] : memref<1x8x6xf32, #tpu.memory_space<vmem>>, vector<1x8x1xf32>
    %100 = vector.shape_cast %99 : vector<1x8x1xf32> to vector<8x1xf32>
    %c0_57 = arith.constant 0 : index
    %c0_58 = arith.constant 0 : index
    %c3_59 = arith.constant 3 : index
    %101 = vector.load %arg5[%c0_57, %c0_58, %c3_59] : memref<1x8x6xf32, #tpu.memory_space<vmem>>, vector<1x8x1xf32>
    %102 = vector.shape_cast %101 : vector<1x8x1xf32> to vector<8x1xf32>
    %cst_60 = arith.constant dense<0.000000e+00> : vector<8xf32>
    %103 = vector.multi_reduction <add>, %73, %cst_60 [1] : vector<8x512xf32> to vector<8xf32>
    %104 = vector.shape_cast %103 : vector<8xf32> to vector<8x1xf32>
    %cst_61 = arith.constant 0.001953125 : f32
    %105 = vector.broadcast %cst_61 : f32 to vector<8x1xf32>
    %106 = arith.mulf %104, %105 : vector<8x1xf32>
    %107 = arith.mulf %73, %73 : vector<8x512xf32>
    %cst_62 = arith.constant dense<0.000000e+00> : vector<8xf32>
    %108 = vector.multi_reduction <add>, %107, %cst_62 [1] : vector<8x512xf32> to vector<8xf32>
    %109 = vector.shape_cast %108 : vector<8xf32> to vector<8x1xf32>
    %cst_63 = arith.constant 0.001953125 : f32
    %110 = vector.broadcast %cst_63 : f32 to vector<8x1xf32>
    %111 = arith.mulf %109, %110 : vector<8x1xf32>
    %112 = arith.mulf %106, %106 : vector<8x1xf32>
    %113 = arith.subf %111, %112 : vector<8x1xf32>
    %cst_64 = arith.constant 9.99999974E-6 : f32
    %114 = vector.broadcast %cst_64 : f32 to vector<8x1xf32>
    %115 = arith.addf %113, %114 : vector<8x1xf32>
    %116 = math.rsqrt %115 : vector<8x1xf32>
    %117 = arith.mulf %100, %116 : vector<8x1xf32>
    %118 = arith.mulf %106, %117 : vector<8x1xf32>
    %119 = arith.subf %102, %118 : vector<8x1xf32>
    %120 = vector.broadcast %117 : vector<8x1xf32> to vector<8x512xf32>
    %121 = arith.mulf %73, %120 : vector<8x512xf32>
    %122 = vector.broadcast %119 : vector<8x1xf32> to vector<8x512xf32>
    %123 = arith.addf %121, %122 : vector<8x512xf32>
    %cst_65 = arith.constant 0.000000e+00 : f32
    %124 = vector.broadcast %cst_65 : f32 to vector<8x512xf32>
    %125 = arith.maximumf %123, %124 : vector<8x512xf32>
    %c0_66 = arith.constant 0 : index
    %c0_67 = arith.constant 0 : index
    %c4 = arith.constant 4 : index
    %126 = vector.load %arg5[%c0_66, %c0_67, %c4] : memref<1x8x6xf32, #tpu.memory_space<vmem>>, vector<1x8x1xf32>
    %127 = vector.shape_cast %126 : vector<1x8x1xf32> to vector<8x1xf32>
    %c0_68 = arith.constant 0 : index
    %c0_69 = arith.constant 0 : index
    %c5_70 = arith.constant 5 : index
    %128 = vector.load %arg5[%c0_68, %c0_69, %c5_70] : memref<1x8x6xf32, #tpu.memory_space<vmem>>, vector<1x8x1xf32>
    %129 = vector.shape_cast %128 : vector<1x8x1xf32> to vector<8x1xf32>
    %cst_71 = arith.constant dense<0.000000e+00> : vector<8xf32>
    %130 = vector.multi_reduction <add>, %125, %cst_71 [1] : vector<8x512xf32> to vector<8xf32>
    %131 = vector.shape_cast %130 : vector<8xf32> to vector<8x1xf32>
    %cst_72 = arith.constant 0.001953125 : f32
    %132 = vector.broadcast %cst_72 : f32 to vector<8x1xf32>
    %133 = arith.mulf %131, %132 : vector<8x1xf32>
    %134 = arith.mulf %125, %125 : vector<8x512xf32>
    %cst_73 = arith.constant dense<0.000000e+00> : vector<8xf32>
    %135 = vector.multi_reduction <add>, %134, %cst_73 [1] : vector<8x512xf32> to vector<8xf32>
    %136 = vector.shape_cast %135 : vector<8xf32> to vector<8x1xf32>
    %cst_74 = arith.constant 0.001953125 : f32
    %137 = vector.broadcast %cst_74 : f32 to vector<8x1xf32>
    %138 = arith.mulf %136, %137 : vector<8x1xf32>
    %139 = arith.mulf %133, %133 : vector<8x1xf32>
    %140 = arith.subf %138, %139 : vector<8x1xf32>
    %cst_75 = arith.constant 9.99999974E-6 : f32
    %141 = vector.broadcast %cst_75 : f32 to vector<8x1xf32>
    %142 = arith.addf %140, %141 : vector<8x1xf32>
    %143 = math.rsqrt %142 : vector<8x1xf32>
    %144 = arith.mulf %127, %143 : vector<8x1xf32>
    %145 = arith.mulf %133, %144 : vector<8x1xf32>
    %146 = arith.subf %129, %145 : vector<8x1xf32>
    %147 = vector.broadcast %144 : vector<8x1xf32> to vector<8x512xf32>
    %148 = arith.mulf %125, %147 : vector<8x512xf32>
    %149 = vector.broadcast %146 : vector<8x1xf32> to vector<8x512xf32>
    %150 = arith.addf %148, %149 : vector<8x512xf32>
    %cst_76 = arith.constant 0.000000e+00 : f32
    %151 = vector.broadcast %cst_76 : f32 to vector<8x512xf32>
    %152 = arith.maximumf %150, %151 : vector<8x512xf32>
    %153 = arith.addf %152, %98 : vector<8x512xf32>
    %c0_77 = arith.constant 0 : index
    %c0_78 = arith.constant 0 : index
    %c4_79 = arith.constant 4 : index
    %154 = vector.load %arg5[%c0_77, %c0_78, %c4_79] : memref<1x8x6xf32, #tpu.memory_space<vmem>>, vector<1x8x1xf32>
    %155 = vector.shape_cast %154 : vector<1x8x1xf32> to vector<8x1xf32>
    %c0_80 = arith.constant 0 : index
    %c0_81 = arith.constant 0 : index
    %c5_82 = arith.constant 5 : index
    %156 = vector.load %arg5[%c0_80, %c0_81, %c5_82] : memref<1x8x6xf32, #tpu.memory_space<vmem>>, vector<1x8x1xf32>
    %157 = vector.shape_cast %156 : vector<1x8x1xf32> to vector<8x1xf32>
    %cst_83 = arith.constant dense<0.000000e+00> : vector<8xf32>
    %158 = vector.multi_reduction <add>, %153, %cst_83 [1] : vector<8x512xf32> to vector<8xf32>
    %159 = vector.shape_cast %158 : vector<8xf32> to vector<8x1xf32>
    %cst_84 = arith.constant 0.001953125 : f32
    %160 = vector.broadcast %cst_84 : f32 to vector<8x1xf32>
    %161 = arith.mulf %159, %160 : vector<8x1xf32>
    %162 = arith.mulf %153, %153 : vector<8x512xf32>
    %cst_85 = arith.constant dense<0.000000e+00> : vector<8xf32>
    %163 = vector.multi_reduction <add>, %162, %cst_85 [1] : vector<8x512xf32> to vector<8xf32>
    %164 = vector.shape_cast %163 : vector<8xf32> to vector<8x1xf32>
    %cst_86 = arith.constant 0.001953125 : f32
    %165 = vector.broadcast %cst_86 : f32 to vector<8x1xf32>
    %166 = arith.mulf %164, %165 : vector<8x1xf32>
    %167 = arith.mulf %161, %161 : vector<8x1xf32>
    %168 = arith.subf %166, %167 : vector<8x1xf32>
    %cst_87 = arith.constant 9.99999974E-6 : f32
    %169 = vector.broadcast %cst_87 : f32 to vector<8x1xf32>
    %170 = arith.addf %168, %169 : vector<8x1xf32>
    %171 = math.rsqrt %170 : vector<8x1xf32>
    %172 = arith.mulf %155, %171 : vector<8x1xf32>
    %173 = arith.mulf %161, %172 : vector<8x1xf32>
    %174 = arith.subf %157, %173 : vector<8x1xf32>
    %175 = vector.broadcast %172 : vector<8x1xf32> to vector<8x512xf32>
    %176 = arith.mulf %153, %175 : vector<8x512xf32>
    %177 = vector.broadcast %174 : vector<8x1xf32> to vector<8x512xf32>
    %178 = arith.addf %176, %177 : vector<8x512xf32>
    %cst_88 = arith.constant 0.000000e+00 : f32
    %179 = vector.broadcast %cst_88 : f32 to vector<8x512xf32>
    %180 = arith.maximumf %178, %179 : vector<8x512xf32>
    %c1_i32_89 = arith.constant 1 : i32
    %181 = arith.cmpi slt, %arg0, %c1_i32_89 : i32
    %182 = arith.extui %181 : i1 to i32
    %c0_i32_90 = arith.constant 0 : i32
    %183 = arith.cmpi ne, %182, %c0_i32_90 : i32
    scf.if %183 {
      %c0_93 = arith.constant 0 : index
      %c0_94 = arith.constant 0 : index
      %187 = vector.load %arg7[%c0_93, %c0_94] : memref<8x512xf32, #tpu.memory_space<vmem>>, vector<8x512xf32>
      tpu.vector_store %arg7[%c0_93, %c0_94], %180 {strides = array<i32>} : memref<8x512xf32, #tpu.memory_space<vmem>>, vector<8x512xf32>,
    } else {
    }
    %c1_i32_91 = arith.constant 1 : i32
    %184 = arith.cmpi eq, %arg0, %c1_i32_91 : i32
    %185 = arith.extui %184 : i1 to i32
    %c0_i32_92 = arith.constant 0 : i32
    %186 = arith.cmpi ne, %185, %c0_i32_92 : i32
    scf.if %186 {
      %c0_93 = arith.constant 0 : index
      %c0_94 = arith.constant 0 : index
      %187 = vector.load %arg6[%c0_93, %c0_94] : memref<8x512xf32, #tpu.memory_space<vmem>>, vector<8x512xf32>
      tpu.vector_store %arg6[%c0_93, %c0_94], %180 {strides = array<i32>} : memref<8x512xf32, #tpu.memory_space<vmem>>, vector<8x512xf32>,
    } else {
    }
    return
  }
  func.func @transform_0(%arg0: i32) -> (i32, i32) {
    %c0_i32 = arith.constant 0 : i32
    %c0_i32_0 = arith.constant 0 : i32
    %c0_i32_1 = arith.constant 0 : i32
    return %c0_i32, %c0_i32_0 : i32, i32
  }
  func.func @transform_1(%arg0: i32) -> (i32, i32) {
    %c0_i32 = arith.constant 0 : i32
    %c0_i32_0 = arith.constant 0 : i32
    %c0_i32_1 = arith.constant 0 : i32
    return %c0_i32, %c0_i32_0 : i32, i32
  }
  func.func @transform_2(%arg0: i32) -> (i32, i32, i32) {
    %c0_i32 = arith.constant 0 : i32
    %c0_i32_0 = arith.constant 0 : i32
    %c0_i32_1 = arith.constant 0 : i32
    return %arg0, %c0_i32, %c0_i32_0 : i32, i32, i32
  }
  func.func @transform_3(%arg0: i32) -> (i32, i32, i32) {
    %c0_i32 = arith.constant 0 : i32
    %c0_i32_0 = arith.constant 0 : i32
    %c0_i32_1 = arith.constant 0 : i32
    return %arg0, %c0_i32, %c0_i32_0 : i32, i32, i32
  }
  func.func @transform_4(%arg0: i32) -> (i32, i32, i32) {
    %c0_i32 = arith.constant 0 : i32
    %c0_i32_0 = arith.constant 0 : i32
    %c0_i32_1 = arith.constant 0 : i32
    return %arg0, %c0_i32, %c0_i32_0 : i32, i32, i32
  }
  func.func @transform_5(%arg0: i32) -> (i32, i32) {
    %c0_i32 = arith.constant 0 : i32
    %c0_i32_0 = arith.constant 0 : i32
    %c0_i32_1 = arith.constant 0 : i32
    return %c0_i32, %c0_i32_0 : i32, i32
  }
}

</mosaic_0001>

<bundles_post_ra>
// kernel: respath_forward.1
= control target key start
LH: loop header
LB: loop body
LE: loop exit
PB: predicated region body
PF: predicated region fallthrough
CT: control target
= control target key end

     0   :  { %s2499_s18 = smov 0   ;;  %s2826_s0 = inlined_call_operand.vmem [shape: f32[8,512], index: 0, kind: input, shape index: {}]   ;;  %s2827_s1 = inlined_call_operand.vmem [shape: f32[16,512], index: 1, kind: input, shape index: {}]   ;;  %s2828_s2 = inlined_call_operand.vmem [shape: f32[2,72,8], index: 2, kind: input, shape index: {}]   ;;  %s2829_s3 = inlined_call_operand.vmem [shape: f32[2,8,8], index: 3, kind: input, shape index: {}]   ;;  %s2830_s4 = inlined_call_operand.vmem [shape: f32[2,8,6], index: 4, kind: input, shape index: {}]   ;;  %s2831_s5 = inlined_call_operand.vmem [shape: f32[8,512], index: 5, kind: output, shape index: {}]  }
   0x1 LB: > { %s2505_s19 = sadd.s32 4294967295, %s2452_s18   ;;  %p2338_p0 = scmp.ge.s32.totalorder %s2452_s18, 1  ;;  %s2452_s18 = sphi %s2499_s18, %s15_s18  }
   0x2   : > { %p200_p1 = scmp.lt.s32.totalorder %s2452_s18, 3 }
   0x4   : > { %p201_p2 = pnand %p2338_p0, %p200_p1 }
   0x5   : > { %p231_p3 = scmp.lt.s32.totalorder (!%p201_p2), %s2505_s19, 1  ;;  %p2342_p4 = scmp.ne.s32.totalorder (!%p201_p2), %s2505_s19, 0 }
   0x6   : > { %204 = sbr.rel (%p201_p2) target bundleno = 1699 (0x6a3), region = 40 }
   0xd   : > { %s232_s20 = scalar_select %p231_p3, %s2505_s19, 1 }
   0xe   : > { %247 = sbr.rel (%p2342_p4) target bundleno = 21 (0x15), region = 44  ;;  %v248_v0 = vld [vmem:[%s2826_s0] sm:$0xff] (!%p2342_p4)  ;;  %v249_v1 = vld [vmem:[%s2826_s0 + $0x8] sm:$0xff] (!%p2342_p4)  ;;  %v250_v2 = vld [vmem:[%s2826_s0 + $0x10] sm:$0xff] (!%p2342_p4) }
   0xf   : > { %s2406_s21 = smul.u32 72, %s232_s20  ;;  %s2340_s22 = sshll.u32 %s232_s20, 3  ;;  %252 = vst [vmem:[#allocation2] sm:$0xff] (!%p2342_p4), %v248_v0  ;;  %253 = vst [vmem:[#allocation2 + $0x8] sm:$0xff] (!%p2342_p4), %v249_v1  ;;  %v251_v3 = vld [vmem:[%s2826_s0 + $0x18] sm:$0xff] (!%p2342_p4) }
  0x10   : > { %s239_s25 = scalar_lea.vmem %s2829_s3, %s2340_s22  ;;  %s2517_s28 = scalar_lea.vmem %s2830_s4, %s2340_s22  ;;  %254 = vst [vmem:[#allocation2 + $0x10] sm:$0xff] (!%p2342_p4), %v250_v2  ;;  %255 = vst [vmem:[#allocation2 + $0x18] sm:$0xff] (!%p2342_p4), %v251_v3 }
  0x11   : > { %s2522_s6 = scalar_lea.vmem %s2828_s2, %s2406_s21 }
  0x15 PF: > { %s2454_s15 = smov 17   ;;  %v2455_v8 = vmov 0.0   ;;  %v260_v9 = vld [vmem:[%s239_s25] sm:$0xff]  ;;  %vm261_vm0 = vcmask 64512   ;;  %s2456_s16 = smov 16   ;;  %v416_v10 = vlaneseq }
  0x16   : > { %v2539_v5 = vld [vmem:[#allocation2] sm:$0xff]  ;;  %v2543_v6 = vld [vmem:[#allocation2 + $0x8] sm:$0xff]  ;;  %329 = vmatprep.mubr.f32.mxu0 %v2455_v8  ;;  %400 = vmatprep.mubr.f32.mxu1 %v2455_v8  ;;  %s2457_s17 = smov 15   ;;  %s2458_s20 = smov 1  }
  0x17   : > { %v2537_v4 = vld [vmem:[#allocation2 + $0x18] sm:$0xff]  ;;  %408 = vrot.lane.b32.xlu0 %v2539_v5, %s2454_s15  ;;  %v2545_v7 = vld [vmem:[#allocation2 + $0x10] sm:$0xff]  ;;  %265 = vmatprep.subr.mxu0 %v2543_v6  ;;  %s2459_s21 = smov 127   ;;  %s2460_s22 = smov 113   ;;  %v426_v11 = vshrl.u32 %v416_v10, 7  ;;  %v2591_v12 = vand.u32 127, %v416_v10 }
  0x18   : > { %414 = vrot.lane.b32.xlu1 %v2537_v4, %s2454_s15  ;;  %336 = vmatprep.subr.mxu1 %v2537_v4  ;;  %s2461_s23 = smov 112   ;;  %s2462_s24 = smov 111   ;;  %v423_v18 = vld [vmem:[%s2827_s1] ss:$8 sm:$0xf] }
  0x19   : > { %266 = vmatpush1.msra.mxu0 %v2539_v5  ;;  %337 = vmatpush1.msra.mxu1 %v2545_v7  ;;  %v2593_v13 = vsub.s32 3, %v426_v11  ;;  %v2595_v14 = vsub.s32 1, %v426_v11  ;;  %v2597_v15 = vsub.s32 2, %v426_v11  ;;  %v2599_v16 = vsub.s32 0, %v426_v11  ;;  %v449_v36 = vld [vmem:[%s2522_s6] sm:$0xff]  ;;  %p2370_p5 = scmp.ge.s32.totalorder %s2505_s19, 1 }
  0x1a   : > { %2343 = vmatmul.mubr.msk.f32.vlgmr.msra.gmra.mrb[0].mxu0 %vm261_vm0, %v260_v9  ;;  %2344 = vmatmul.mubr.msk.f32.vlgmr.msra.gmra.mrb[0].mxu1 %vm261_vm0, %v260_v9  ;;  %vm418_vm1 = vcmp.lt.s32.totalorder %v2591_v12, 17  ;;  %v2349_v24 = vld [vmem:[%s2827_s1 + $0x1] ss:$8 sm:$0xf]  ;;  %vm748_vm2 = vcmp.lt.s32.totalorder %v2591_v12, 16  ;;  %vm938_vm3 = vcmp.lt.s32.totalorder %v2591_v12, 15 }
  0x1b   : > { %410 = vrot.lane.b32.xlu0 %v2543_v6, %s2454_s15  ;;  %588 = vmatprep.mubr.f32.mxu1 %v2455_v8  ;;  %v440_v20 = vrot.slane %v423_v18, %v2593_v13  ;;  %v432_v21 = vrot.slane %v423_v18, %v2595_v14  ;;  %v436_v22 = vrot.slane %v423_v18, %v2597_v15  ;;  %v2352_v44 = vld [vmem:[%s2827_s1 + $0x2] ss:$8 sm:$0xf]  ;;  %v2355_v62 = vld [vmem:[%s2827_s1 + $0x3] ss:$8 sm:$0xf] }
  0x1c   : > { %412 = vrot.lane.b32.xlu1 %v2545_v7, %s2454_s15  ;;  %517 = vmatprep.mubr.f32.mxu0 %v2455_v8  ;;  %v428_v23 = vrot.slane %v423_v18, %v2599_v16  ;;  %v763_v34 = vrot.slane %v2349_v24, %v2595_v14  ;;  %v771_v41 = vrot.slane %v2349_v24, %v2593_v13  ;;  %v407_v54 = vld [vmem:[%s2522_s6 + $0x20] sm:$0xff]  ;;  %vm1128_vm4 = vcmp.lt.s32.totalorder %v2591_v12, 1  ;;  %v780_v9 = vld [vmem:[%s2522_s6 + $0x8] sm:$0xff] }
  0x1d   : > { %v759_v42 = vrot.slane %v2349_v24, %v2599_v16  ;;  %v767_v43 = vrot.slane %v2349_v24, %v2597_v15  ;;  %v953_v51 = vrot.slane %v2352_v44, %v2595_v14  ;;  %v961_v59 = vrot.slane %v2352_v44, %v2593_v13 }
  0x1e   : > { %v949_v60 = vrot.slane %v2352_v44, %v2599_v16  ;;  %v957_v61 = vrot.slane %v2352_v44, %v2597_v15  ;;  %vm1318_vm5 = vcmp.lt.s32.totalorder %v2591_v12, 127  ;;  %vm1508_vm6 = vcmp.lt.s32.totalorder %v2591_v12, 113 }
  0x1f   : > { %740 = vrot.lane.b32.xlu0 %v2539_v5, %s2456_s16  ;;  %vm1698_vm7 = vcmp.lt.s32.totalorder %v2591_v12, 112  ;;  %vm1888_vm8 = vcmp.lt.s32.totalorder %v2591_v12, 111 }
  0x20   : > { %742 = vrot.lane.b32.xlu1 %v2543_v6, %s2456_s16 }
  0x23   : > { %746 = vrot.lane.b32.xlu0 %v2537_v4, %s2456_s16 }
  0x24   : > { %744 = vrot.lane.b32.xlu1 %v2545_v7, %s2456_s16 }
  0x27   : > { %930 = vrot.lane.b32.xlu0 %v2539_v5, %s2457_s17 }
  0x28   : > { %932 = vrot.lane.b32.xlu1 %v2543_v6, %s2457_s17 }
  0x2b   : > { %936 = vrot.lane.b32.xlu0 %v2537_v4, %s2457_s17 }
  0x2c   : > { %934 = vrot.lane.b32.xlu1 %v2545_v7, %s2457_s17 }
  0x2f   : > { %1120 = vrot.lane.b32.xlu0 %v2539_v5, %s2458_s20 }
  0x30   : > { %1122 = vrot.lane.b32.xlu1 %v2543_v6, %s2458_s20 }
  0x33   : > { %1126 = vrot.lane.b32.xlu0 %v2537_v4, %s2458_s20 }
  0x34   : > { %1124 = vrot.lane.b32.xlu1 %v2545_v7, %s2458_s20 }
  0x37   : > { %1312 = vrot.lane.b32.xlu0 %v2543_v6, %s2459_s21 }
  0x38   : > { %1314 = vrot.lane.b32.xlu1 %v2545_v7, %s2459_s21 }
  0x3b   : > { %1310 = vrot.lane.b32.xlu0 %v2539_v5, %s2459_s21 }
  0x3c   : > { %1316 = vrot.lane.b32.xlu1 %v2537_v4, %s2459_s21 }
  0x3f   : > { %1502 = vrot.lane.b32.xlu0 %v2543_v6, %s2460_s22 }
  0x40   : > { %1504 = vrot.lane.b32.xlu1 %v2545_v7, %s2460_s22 }
  0x43   : > { %1500 = vrot.lane.b32.xlu0 %v2539_v5, %s2460_s22 }
  0x44   : > { %1506 = vrot.lane.b32.xlu1 %v2537_v4, %s2460_s22 }
  0x47   : > { %1692 = vrot.lane.b32.xlu0 %v2543_v6, %s2461_s23 }
  0x48   : > { %1694 = vrot.lane.b32.xlu1 %v2545_v7, %s2461_s23 }
  0x4b   : > { %1690 = vrot.lane.b32.xlu0 %v2539_v5, %s2461_s23 }
  0x4c   : > { %1696 = vrot.lane.b32.xlu1 %v2537_v4, %s2461_s23 }
  0x4f   : > { %1882 = vrot.lane.b32.xlu0 %v2543_v6, %s2462_s24 }
  0x50   : > { %1884 = vrot.lane.b32.xlu1 %v2545_v7, %s2462_s24 }
  0x53   : > { %1880 = vrot.lane.b32.xlu0 %v2539_v5, %s2462_s24 }
  0x54   : > { %1886 = vrot.lane.b32.xlu1 %v2537_v4, %s2462_s24 }
  0x89   : > { %v409_v19 = vpop.permute.xlu0 %408 }
  0x8a   : > { %v415_v17 = vpop.permute.xlu1 %414 }
  0x8b   : > { %v422_v25 = vsel %vm418_vm1, %v415_v17, %v409_v19 }
  0x8c   : > { %v445_v35 = vmul.f32 %v428_v23, %v422_v25 }
  0x8d   : > { %v411_v27 = vpop.permute.xlu0 %410 }
  0x8e   : > { %v413_v26 = vpop.permute.xlu1 %412  ;;  %v421_v30 = vsel %vm418_vm1, %v409_v19, %v411_v27  ;;  %v1151_v19 = vrot.slane %v2355_v62, %v2593_v13 }
  0x8f   : > { %v419_v28 = vsel %vm418_vm1, %v413_v26, %v415_v17  ;;  %v420_v29 = vsel %vm418_vm1, %v411_v27, %v413_v26  ;;  %v446_v32 = vmul.f32 %v432_v21, %v421_v30  ;;  %v1147_v21 = vrot.slane %v2355_v62, %v2597_v15 }
  0x90   : > { %v448_v31 = vmul.f32 %v440_v20, %v419_v28  ;;  %v447_v33 = vmul.f32 %v436_v22, %v420_v29  ;;  %v1139_v20 = vrot.slane %v2355_v62, %v2599_v16  ;;  %v2358_v22 = vld [vmem:[%s2827_s1 + $0x5] ss:$8 sm:$0xf] }
  0x91   : > { %453 = vmatprep.subr.mxu0 %v446_v32  ;;  %v741_v37 = vpop.permute.xlu0 %740  ;;  %v1333_v29 = vrot.slane %v2358_v22, %v2595_v14  ;;  %v970_v32 = vld [vmem:[%s2522_s6 + $0x10] sm:$0xff] }
  0x92   : > { %524 = vmatprep.subr.mxu1 %v448_v31  ;;  %v743_v38 = vpop.permute.xlu1 %742  ;;  %454 = vmatpush1.msra.mxu0 %v445_v35 }
  0x93   : > { %525 = vmatpush1.msra.mxu1 %v447_v33  ;;  %v751_v39 = vsel %vm748_vm2, %v741_v37, %v743_v38  ;;  %2345 = vmatmul.mubr.msk.f32.vlgmr.msra.gmra.mrb[2].mxu0 %vm261_vm0, %v449_v36 }
  0x94   : > { %v777_v40 = vmul.f32 %v763_v34, %v751_v39  ;;  %2346 = vmatmul.mubr.msk.f32.vlgmr.msra.gmra.mrb[2].mxu1 %vm261_vm0, %v449_v36  ;;  %598 = vmatprep.subr.mxu0 %v2543_v6  ;;  %v1337_v39 = vrot.slane %v2358_v22, %v2597_v15 }
  0x95   : > { %669 = vmatprep.subr.mxu1 %v2537_v4  ;;  %v747_v45 = vpop.permute.xlu0 %746  ;;  %599 = vmatpush1.msra.mxu0 %v2539_v5  ;;  %v1143_v5 = vrot.slane %v2355_v62, %v2595_v14 }
  0x96   : > { %v745_v46 = vpop.permute.xlu1 %744  ;;  %670 = vmatpush1.msra.mxu1 %v2545_v7  ;;  %v752_v47 = vsel %vm748_vm2, %v747_v45, %v741_v37  ;;  %733 = vmatprep.mubr.f32.mxu1 %v2455_v8  ;;  %v1341_v37 = vrot.slane %v2358_v22, %v2593_v13 }
  0x97   : > { %v749_v48 = vsel %vm748_vm2, %v745_v46, %v747_v45  ;;  %v750_v49 = vsel %vm748_vm2, %v743_v38, %v745_v46  ;;  %662 = vmatprep.mubr.f32.mxu0 %v2455_v8  ;;  %784 = vmatprep.subr.mxu0 %v777_v40  ;;  %v776_v52 = vmul.f32 %v759_v42, %v752_v47  ;;  %v2361_v40 = vld [vmem:[%s2827_s1 + $0x6] ss:$8 sm:$0xf] }
  0x98   : > { %v779_v50 = vmul.f32 %v771_v41, %v749_v48  ;;  %v778_v53 = vmul.f32 %v767_v43, %v750_v49  ;;  %v1329_v38 = vrot.slane %v2358_v22, %v2599_v16  ;;  %v1523_v47 = vrot.slane %v2361_v40, %v2595_v14 }
  0x99   : > { %v931_v55 = vpop.permute.xlu0 %930 }
  0x9a   : > { %v933_v56 = vpop.permute.xlu1 %932  ;;  %855 = vmatprep.subr.mxu1 %v779_v50  ;;  %v1160_v50 = vld [vmem:[%s2522_s6 + $0x18] sm:$0xff] }
  0x9b   : > { %v941_v57 = vsel %vm938_vm3, %v931_v55, %v933_v56  ;;  %2347 = vmatmul.mubr.msk.f32.vlgmr.msra.gmra.mrb[2].mxu0 %vm261_vm0, %v407_v54 }
  0x9c   : > { %v967_v58 = vmul.f32 %v953_v51, %v941_v57  ;;  %2348 = vmatmul.mubr.msk.f32.vlgmr.msra.gmra.mrb[2].mxu1 %vm261_vm0, %v407_v54  ;;  %785 = vmatpush1.msra.mxu0 %v776_v52  ;;  %v1527_v57 = vrot.slane %v2361_v40, %v2597_v15 }
  0x9d   : > { %856 = vmatpush1.msra.mxu1 %v778_v53  ;;  %v937_v63 = vpop.permute.xlu0 %936  ;;  %919 = vmatprep.mubr.f32.mxu1 %v2455_v8 }
  0x9e   : > { %v935_v0 = vpop.permute.xlu1 %934  ;;  %848 = vmatprep.mubr.f32.mxu0 %v2455_v8  ;;  %v942_v1 = vsel %vm938_vm3, %v937_v63, %v931_v55  ;;  %974 = vmatprep.subr.mxu0 %v967_v58  ;;  %v1531_v55 = vrot.slane %v2361_v40, %v2593_v13  ;;  %v2364_v58 = vld [vmem:[%s2827_s1 + $0x7] ss:$8 sm:$0xf] }
  0x9f   : > { %v939_v2 = vsel %vm938_vm3, %v935_v0, %v937_v63  ;;  %v940_v3 = vsel %vm938_vm3, %v933_v56, %v935_v0  ;;  %v966_v6 = vmul.f32 %v949_v60, %v942_v1  ;;  %v1519_v56 = vrot.slane %v2361_v40, %v2599_v16  ;;  %v1730_v40 = vld [vmem:[%s2522_s6 + $0x38] sm:$0xff] }
  0xa0   : > { %v969_v4 = vmul.f32 %v961_v59, %v939_v2  ;;  %v968_v7 = vmul.f32 %v957_v61, %v940_v3  ;;  %v1713_v1 = vrot.slane %v2364_v58, %v2595_v14 }
  0xa1   : > { %v1121_v10 = vpop.permute.xlu0 %1120 }
  0xa2   : > { %v1123_v11 = vpop.permute.xlu1 %1122  ;;  %1045 = vmatprep.subr.mxu1 %v969_v4  ;;  %v1350_v4 = vld [vmem:[%s2522_s6 + $0x28] sm:$0xff] }
  0xa3   : > { %v1131_v17 = vsel %vm1128_vm4, %v1121_v10, %v1123_v11  ;;  %2350 = vmatmul.mubr.msk.f32.vlgmr.msra.gmra.mrb[2].mxu0 %vm261_vm0, %v780_v9 }
  0xa4   : > { %v1157_v18 = vmul.f32 %v1143_v5, %v1131_v17  ;;  %2351 = vmatmul.mubr.msk.f32.vlgmr.msra.gmra.mrb[2].mxu1 %vm261_vm0, %v780_v9  ;;  %975 = vmatpush1.msra.mxu0 %v966_v6  ;;  %v1717_v17 = vrot.slane %v2364_v58, %v2597_v15 }
  0xa5   : > { %1046 = vmatpush1.msra.mxu1 %v968_v7  ;;  %v1127_v23 = vpop.permute.xlu0 %1126  ;;  %1109 = vmatprep.mubr.f32.mxu1 %v2455_v8 }
  0xa6   : > { %v1125_v24 = vpop.permute.xlu1 %1124  ;;  %1038 = vmatprep.mubr.f32.mxu0 %v2455_v8  ;;  %v1132_v25 = vsel %vm1128_vm4, %v1127_v23, %v1121_v10  ;;  %1164 = vmatprep.subr.mxu0 %v1157_v18  ;;  %v1721_v10 = vrot.slane %v2364_v58, %v2593_v13  ;;  %v2367_v18 = vld [vmem:[%s2827_s1 + $0x20] ss:$8 sm:$0xf] }
  0xa7   : > { %v1129_v26 = vsel %vm1128_vm4, %v1125_v24, %v1127_v23  ;;  %v1130_v27 = vsel %vm1128_vm4, %v1123_v11, %v1125_v24  ;;  %v1156_v30 = vmul.f32 %v1139_v20, %v1132_v25  ;;  %v1709_v11 = vrot.slane %v2364_v58, %v2599_v16 }
  0xa8   : > { %v1159_v28 = vmul.f32 %v1151_v19, %v1129_v26  ;;  %v1158_v31 = vmul.f32 %v1147_v21, %v1130_v27  ;;  %v1903_v25 = vrot.slane %v2367_v18, %v2595_v14  ;;  %v1899_v14 = vrot.slane %v2367_v18, %v2599_v16 }
  0xa9   : > { %v1313_v33 = vpop.permute.xlu0 %1312 }
  0xaa   : > { %v1315_v34 = vpop.permute.xlu1 %1314  ;;  %1235 = vmatprep.subr.mxu1 %v1159_v28  ;;  %v1540_v28 = vld [vmem:[%s2522_s6 + $0x30] sm:$0xff] }
  0xab   : > { %v1320_v35 = vsel %vm1318_vm5, %v1313_v33, %v1315_v34  ;;  %2353 = vmatmul.mubr.msk.f32.vlgmr.msra.gmra.mrb[2].mxu0 %vm261_vm0, %v970_v32 }
  0xac   : > { %v1347_v36 = vmul.f32 %v1333_v29, %v1320_v35  ;;  %2354 = vmatmul.mubr.msk.f32.vlgmr.msra.gmra.mrb[2].mxu1 %vm261_vm0, %v970_v32  ;;  %1165 = vmatpush1.msra.mxu0 %v1156_v30 }
  0xad   : > { %1236 = vmatpush1.msra.mxu1 %v1158_v31  ;;  %v1311_v41 = vpop.permute.xlu0 %1310  ;;  %1299 = vmatprep.mubr.f32.mxu1 %v2455_v8 }
  0xae   : > { %v1317_v42 = vpop.permute.xlu1 %1316  ;;  %1228 = vmatprep.mubr.f32.mxu0 %v2455_v8  ;;  %v1321_v43 = vsel %vm1318_vm5, %v1311_v41, %v1313_v33  ;;  %1354 = vmatprep.subr.mxu0 %v1347_v36  ;;  %v1911_v33 = vrot.slane %v2367_v18, %v2593_v13 }
  0xaf   : > { %v1319_v44 = vsel %vm1318_vm5, %v1315_v34, %v1317_v42  ;;  %v1322_v45 = vsel %vm1318_vm5, %v1317_v42, %v1311_v41  ;;  %v1346_v48 = vmul.f32 %v1329_v38, %v1321_v43  ;;  %v1907_v34 = vrot.slane %v2367_v18, %v2597_v15  ;;  %v1920_v41 = vld [vmem:[%s2522_s6 + $0x40] sm:$0xff] }
  0xb0   : > { %v1349_v46 = vmul.f32 %v1341_v37, %v1322_v45  ;;  %v1348_v49 = vmul.f32 %v1337_v39, %v1319_v44  ;;  %v2464_v18 = vmov 3  }
  0xb1   : > { %v1503_v51 = vpop.permute.xlu0 %1502  ;;  %2431 = vset.pattern.permute.xlu0 %v2464_v18 }
  0xb2   : > { %v1505_v52 = vpop.permute.xlu1 %1504  ;;  %1425 = vmatprep.subr.mxu1 %v1349_v46 }
  0xb3   : > { %v1510_v53 = vsel %vm1508_vm6, %v1503_v51, %v1505_v52  ;;  %2356 = vmatmul.mubr.msk.f32.vlgmr.msra.gmra.mrb[2].mxu0 %vm261_vm0, %v1160_v50 }
  0xb4   : > { %v1537_v54 = vmul.f32 %v1523_v47, %v1510_v53  ;;  %2357 = vmatmul.mubr.msk.f32.vlgmr.msra.gmra.mrb[2].mxu1 %vm261_vm0, %v1160_v50  ;;  %1355 = vmatpush1.msra.mxu0 %v1346_v48 }
  0xb5   : > { %1426 = vmatpush1.msra.mxu1 %v1348_v49  ;;  %v1501_v59 = vpop.permute.xlu0 %1500  ;;  %1489 = vmatprep.mubr.f32.mxu1 %v2455_v8 }
  0xb6   : > { %v1507_v60 = vpop.permute.xlu1 %1506  ;;  %1418 = vmatprep.mubr.f32.mxu0 %v2455_v8  ;;  %v1511_v61 = vsel %vm1508_vm6, %v1501_v59, %v1503_v51  ;;  %1544 = vmatprep.subr.mxu0 %v1537_v54 }
  0xb7   : > { %v1509_v62 = vsel %vm1508_vm6, %v1505_v52, %v1507_v60  ;;  %v1512_v63 = vsel %vm1508_vm6, %v1507_v60, %v1501_v59  ;;  %v1536_v2 = vmul.f32 %v1519_v56, %v1511_v61 }
  0xb8   : > { %v1539_v0 = vmul.f32 %v1531_v55, %v1512_v63  ;;  %v1538_v3 = vmul.f32 %v1527_v57, %v1509_v62 }
  0xb9   : > { %v1693_v5 = vpop.permute.xlu0 %1692 }
  0xba   : > { %v1695_v6 = vpop.permute.xlu1 %1694  ;;  %1615 = vmatprep.subr.mxu1 %v1539_v0 }
  0xbb   : > { %v1700_v7 = vsel %vm1698_vm7, %v1693_v5, %v1695_v6  ;;  %2359 = vmatmul.mubr.msk.f32.vlgmr.msra.gmra.mrb[2].mxu0 %vm261_vm0, %v1350_v4 }
  0xbc   : > { %v1727_v9 = vmul.f32 %v1713_v1, %v1700_v7  ;;  %2360 = vmatmul.mubr.msk.f32.vlgmr.msra.gmra.mrb[2].mxu1 %vm261_vm0, %v1350_v4  ;;  %1545 = vmatpush1.msra.mxu0 %v1536_v2  ;;  %v2463_v4 = vmov 2  }
  0xbd   : > { %1616 = vmatpush1.msra.mxu1 %v1538_v3  ;;  %v1691_v19 = vpop.permute.xlu0 %1690  ;;  %1679 = vmatprep.mubr.f32.mxu1 %v2455_v8 }
  0xbe   : > { %v1697_v20 = vpop.permute.xlu1 %1696  ;;  %1608 = vmatprep.mubr.f32.mxu0 %v2455_v8  ;;  %v1701_v21 = vsel %vm1698_vm7, %v1691_v19, %v1693_v5  ;;  %1734 = vmatprep.subr.mxu0 %v1727_v9 }
  0xbf   : > { %v1699_v22 = vsel %vm1698_vm7, %v1695_v6, %v1697_v20  ;;  %v1702_v23 = vsel %vm1698_vm7, %v1697_v20, %v1691_v19  ;;  %v1726_v26 = vmul.f32 %v1709_v11, %v1701_v21  ;;  %2430 = vset.pattern.permute.xlu1 %v2463_v4  ;;  %v2789_v19 = vld [vmem:[%s2517_s28] sm:$0xff] }
  0xc0   : > { %v1729_v24 = vmul.f32 %v1721_v10, %v1702_v23  ;;  %v1728_v27 = vmul.f32 %v1717_v17, %v1699_v22 }
  0xc1   : > { %v1883_v29 = vpop.permute.xlu0 %1882 }
  0xc2   : > { %v1885_v30 = vpop.permute.xlu1 %1884  ;;  %1805 = vmatprep.subr.mxu1 %v1729_v24 }
  0xc3   : > { %v1890_v31 = vsel %vm1888_vm8, %v1883_v29, %v1885_v30  ;;  %2362 = vmatmul.mubr.msk.f32.vlgmr.msra.gmra.mrb[2].mxu0 %vm261_vm0, %v1540_v28 }
  0xc4   : > { %v1917_v32 = vmul.f32 %v1903_v25, %v1890_v31  ;;  %2363 = vmatmul.mubr.msk.f32.vlgmr.msra.gmra.mrb[2].mxu1 %vm261_vm0, %v1540_v28  ;;  %1735 = vmatpush1.msra.mxu0 %v1726_v26 }
  0xc5   : > { %1806 = vmatpush1.msra.mxu1 %v1728_v27  ;;  %v1881_v35 = vpop.permute.xlu0 %1880  ;;  %1798 = vmatprep.mubr.f32.mxu0 %v2455_v8 }
  0xc6   : > { %v1887_v36 = vpop.permute.xlu1 %1886  ;;  %1869 = vmatprep.mubr.f32.mxu1 %v2455_v8  ;;  %v1891_v37 = vsel %vm1888_vm8, %v1881_v35, %v1883_v29  ;;  %1924 = vmatprep.subr.mxu0 %v1917_v32 }
  0xc7   : > { %v1889_v13 = vsel %vm1888_vm8, %v1885_v30, %v1887_v36  ;;  %v1892_v38 = vsel %vm1888_vm8, %v1887_v36, %v1881_v35  ;;  %v1916_v39 = vmul.f32 %v1899_v14, %v1891_v37 }
  0xc8   : > { %v1919_v16 = vmul.f32 %v1911_v33, %v1892_v38  ;;  %v1918_v15 = vmul.f32 %v1907_v34, %v1889_v13 }
  0xca   : > { %1995 = vmatprep.subr.mxu1 %v1919_v16 }
  0xcb   : > { %2365 = vmatmul.mubr.msk.f32.vlgmr.msra.gmra.mrb[2].mxu0 %vm261_vm0, %v1730_v40 }
  0xcc   : > { %2366 = vmatmul.mubr.msk.f32.vlgmr.msra.gmra.mrb[2].mxu1 %vm261_vm0, %v1730_v40  ;;  %1925 = vmatpush1.msra.mxu0 %v1916_v39 }
  0xcd   : > { %1996 = vmatpush1.msra.mxu1 %v1918_v15  ;;  %1988 = vmatprep.mubr.f32.mxu0 %v2455_v8 }
  0xce   : > { %2059 = vmatprep.mubr.f32.mxu1 %v2455_v8 }
  0xd3   : > { %2368 = vmatmul.mubr.msk.f32.vlgmr.msra.gmra.mrb[2].mxu0 %vm261_vm0, %v1920_v41 }
  0xd4   : > { %2369 = vmatmul.mubr.msk.f32.vlgmr.msra.gmra.mrb[2].mxu1 %vm261_vm0, %v1920_v41 }
  0xed   : > { %v2768_v12 = vpop.f32.mrb[0].mxu0  ;;  %v2770_v42 = vpop.f32.mrb[0].mxu1 }
  0xee   : > { %v2077_v43 = vmul.f32 %v2768_v12, %v2768_v12  ;;  %v2774_v44 = vpop.f32.mrb[1].mxu0  ;;  %v2776_v45 = vpop.f32.mrb[1].mxu1  ;;  %v2079_v47 = vmul.f32 %v2770_v42, %v2770_v42 }
  0xef   : > { %v2071_v46 = vadd.f32 %v2774_v44, %v2768_v12  ;;  %v2078_v8 = vmul.f32 %v2774_v44, %v2774_v44  ;;  %v2080_v49 = vmul.f32 %v2776_v45, %v2776_v45 }
  0xf1   : > { %v2072_v48 = vadd.f32 %v2071_v46, %v2770_v42  ;;  %v2081_v50 = vadd.f32 %v2078_v8, %v2077_v43 }
  0xf3   : > { %v2073_v51 = vadd.f32 %v2072_v48, %v2776_v45  ;;  %v2082_v52 = vadd.f32 %v2081_v50, %v2079_v47 }
  0xf5   : > { %v2083_v53 = vadd.f32 %v2082_v52, %v2080_v49  ;;  %v2465_v52 = vmov 4  }
 0x1a6   : > { %v1990_v54 = vpop.f32.mrb[2].mxu0 }
 0x1a7   : > { %v2061_v55 = vpop.f32.mrb[2].mxu1  ;;  %v2122_v56 = vmul.f32 %v1990_v54, %v1990_v54  ;;  %v1992_v57 = vpop.f32.mrb[3].mxu0 }
 0x1a8   : > { %v2063_v58 = vpop.f32.mrb[3].mxu1  ;;  %v2116_v59 = vadd.f32 %v1992_v57, %v1990_v54  ;;  %v2123_v60 = vmul.f32 %v1992_v57, %v1992_v57  ;;  %v2124_v61 = vmul.f32 %v2061_v55, %v2061_v55 }
 0x1a9   : > { %v2125_v0 = vmul.f32 %v2063_v58, %v2063_v58 }
 0x1aa   : > { %v2126_v62 = vadd.f32 %v2123_v60, %v2122_v56  ;;  %v2117_v63 = vadd.f32 %v2116_v59, %v2061_v55 }
 0x1ac   : > { %v2118_v1 = vadd.f32 %v2117_v63, %v2063_v58  ;;  %v2127_v2 = vadd.f32 %v2126_v62, %v2124_v61 }
 0x1ae   : > { %2119 = vadd.xlane.f32.xlu0 %v2118_v1  ;;  %v2128_v3 = vadd.f32 %v2127_v2, %v2125_v0  ;;  %v2466_v1 = vmov 5  }
 0x1b0   : > { %2129 = vadd.xlane.f32.xlu1 %v2128_v3 }
 0x23b   : > { %v2120_v5 = vpop.xlane.xlu0 %2119 }
 0x23c   : > { %v2121_v6 = vmul.f32 0.001953125, %v2120_v5  ;;  %v2467_v5 = vmov 0  }
 0x23d   : > { %v2130_v7 = vpop.xlane.xlu1 %2129 }
 0x23e   : > { %v2132_v9 = vmul.f32 %v2121_v6, %v2121_v6  ;;  %v2131_v10 = vmul.f32 0.001953125, %v2130_v7 }
 0x240   : > { %v2133_v11 = vsub.f32 %v2131_v10, %v2132_v9  ;;  %v2468_v9 = vmov 1  }
 0x242   : > { %v2134_v17 = vadd.f32 1e-05, %v2133_v11 }
 0x244   : > { %2438 = vrsqrt.f32 %v2134_v17 }
 0x24e   : > { %v2439_v20 = vpop.eup %2438 }
 0x24f   : > { %v2136_v21 = vmul.f32 %v2439_v20, %v2789_v19 }
 0x251   : > { %2145 = vperm.xlu1 %2430, %v2136_v21   ;;  %v2137_v22 = vmul.f32 %v2136_v21, %v2121_v6 }
 0x253   : > { %2139 = vrot.lane.b32.xlu0 %v2137_v22, %s2458_s20 }
 0x255   : > { %2432 = vset.pattern.permute.xlu1 %v2465_v52 }
 0x2c5   : > { %v2140_v23 = vpop.permute.xlu0 %2139 }
 0x2c6   : > { %v2142_v24 = vsub.f32 %v2789_v19, %v2140_v23 }
 0x2c8   : > { %2154 = vperm.xlu0 %2431, %v2142_v24  }
 0x2cc   : > { %2434 = vset.pattern.permute.xlu0 %v2466_v1 }
 0x2d0   : > { %v2146_v25 = vpop.permute.xlu1 %2145 }
 0x2d1   : > { %v2148_v26 = vmul.f32 %v2146_v25, %v1990_v54  ;;  %v2149_v27 = vmul.f32 %v2146_v25, %v1992_v57  ;;  %v2150_v28 = vmul.f32 %v2146_v25, %v2061_v55  ;;  %v2151_v30 = vmul.f32 %v2146_v25, %v2063_v58 }
 0x2e7   : > { %2074 = vadd.xlane.f32.xlu0 %v2073_v51 }
 0x2eb   : > { %2084 = vadd.xlane.f32.xlu0 %v2083_v53 }
 0x347   : > { %v2155_v29 = vpop.permute.xlu0 %2154 }
 0x348   : > { %v2157_v31 = vadd.f32 %v2155_v29, %v2148_v26  ;;  %v2158_v32 = vadd.f32 %v2155_v29, %v2149_v27  ;;  %v2159_v33 = vadd.f32 %v2155_v29, %v2150_v28  ;;  %v2160_v14 = vadd.f32 %v2155_v29, %v2151_v30 }
 0x34a   : > { %v2161_v34 = vmax.f32 %v2157_v31, 0.0  ;;  %v2162_v35 = vmax.f32 %v2158_v32, 0.0  ;;  %v2163_v36 = vmax.f32 %v2159_v33, 0.0  ;;  %v2164_v16 = vmax.f32 %v2160_v14, 0.0 }
 0x34c   : > { %v2165_v37 = vadd.f32 %v2162_v35, %v2161_v34  ;;  %v2171_v13 = vmul.f32 %v2161_v34, %v2161_v34  ;;  %v2172_v38 = vmul.f32 %v2162_v35, %v2162_v35  ;;  %v2173_v15 = vmul.f32 %v2163_v36, %v2163_v36 }
 0x34d   : > { %v2174_v46 = vmul.f32 %v2164_v16, %v2164_v16 }
 0x34e   : > { %v2166_v39 = vadd.f32 %v2165_v37, %v2163_v36  ;;  %v2175_v40 = vadd.f32 %v2172_v38, %v2171_v13 }
 0x350   : > { %v2167_v41 = vadd.f32 %v2166_v39, %v2164_v16  ;;  %v2176_v43 = vadd.f32 %v2175_v40, %v2173_v15 }
 0x352   : > { %2168 = vadd.xlane.f32.xlu1 %v2167_v41  ;;  %v2177_v8 = vadd.f32 %v2176_v43, %v2174_v46 }
 0x356   : > { %2178 = vadd.xlane.f32.xlu1 %v2177_v8 }
 0x374   : > { %v2075_v47 = vpop.xlane.xlu0 %2074 }
 0x375   : > { %v2076_v48 = vmul.f32 0.001953125, %v2075_v47 }
 0x377   : > { %v2087_v50 = vmul.f32 %v2076_v48, %v2076_v48 }
 0x378   : > { %v2085_v49 = vpop.xlane.xlu0 %2084 }
 0x379   : > { %v2086_v51 = vmul.f32 0.001953125, %v2085_v49 }
 0x37b   : > { %v2088_v53 = vsub.f32 %v2086_v51, %v2087_v50 }
 0x37d   : > { %v2089_v54 = vadd.f32 1e-05, %v2088_v53 }
 0x37f   : > { %2440 = vrsqrt.f32 %v2089_v54 }
 0x389   : > { %v2441_v55 = vpop.eup %2440 }
 0x38a   : > { %v2091_v56 = vmul.f32 %v2441_v55, %v2789_v19 }
 0x38c   : > { %v2092_v57 = vmul.f32 %v2091_v56, %v2076_v48 }
 0x38e   : > { %2094 = vrot.lane.b32.xlu0 %v2092_v57, %s2458_s20 }
 0x3df   : > { %v2169_v58 = vpop.xlane.xlu1 %2168 }
 0x3e0   : > { %v2170_v59 = vmul.f32 0.001953125, %v2169_v58 }
 0x3e2   : > { %v2181_v61 = vmul.f32 %v2170_v59, %v2170_v59 }
 0x3e3   : > { %v2179_v60 = vpop.xlane.xlu1 %2178 }
 0x3e4   : > { %v2180_v62 = vmul.f32 0.001953125, %v2179_v60 }
 0x3e6   : > { %v2182_v63 = vsub.f32 %v2180_v62, %v2181_v61 }
 0x3e8   : > { %v2183_v0 = vadd.f32 1e-05, %v2182_v63 }
 0x3ea   : > { %2442 = vrsqrt.f32 %v2183_v0 }
 0x3f4   : > { %v2443_v2 = vpop.eup %2442 }
 0x3f5   : > { %v2185_v3 = vmul.f32 %v2443_v2, %v2789_v19 }
 0x3f7   : > { %v2186_v4 = vmul.f32 %v2185_v3, %v2170_v59 }
 0x3f9   : > { %2188 = vrot.lane.b32.xlu1 %v2186_v4, %s2458_s20 }
 0x3fd   : > { %2194 = vperm.xlu1 %2432, %v2185_v3  }
 0x400   : > { %v2095_v6 = vpop.permute.xlu0 %2094 }
 0x401   : > { %2433 = vset.pattern.permute.xlu1 %v2467_v5  ;;  %v2097_v7 = vsub.f32 %v2789_v19, %v2095_v6 }
 0x402   : > { %2100 = vperm.xlu1 %2433, %v2091_v56  }
 0x406   : > { %2435 = vset.pattern.permute.xlu1 %v2468_v9 }
 0x407   : > { %2109 = vperm.xlu1 %2435, %v2097_v7  }
 0x40b   : > { %2436 = vset.pattern.permute.xlu1 %v2465_v52 }
 0x46b   : > { %v2189_v10 = vpop.permute.xlu1 %2188 }
 0x46c   : > { %v2191_v11 = vsub.f32 %v2789_v19, %v2189_v10 }
 0x46e   : > { %2203 = vperm.xlu0 %2434, %v2191_v11  }
 0x47c   : > { %v2195_v17 = vpop.permute.xlu1 %2194 }
 0x47d   : > { %v2197_v20 = vmul.f32 %v2195_v17, %v2161_v34  ;;  %v2198_v21 = vmul.f32 %v2195_v17, %v2162_v35  ;;  %v2199_v22 = vmul.f32 %v2195_v17, %v2163_v36  ;;  %v2200_v23 = vmul.f32 %v2195_v17, %v2164_v16 }
 0x481   : > { %v2101_v18 = vpop.permute.xlu1 %2100 }
 0x482   : > { %v2103_v25 = vmul.f32 %v2101_v18, %v2768_v12  ;;  %v2104_v26 = vmul.f32 %v2101_v18, %v2774_v44  ;;  %v2105_v27 = vmul.f32 %v2101_v18, %v2770_v42  ;;  %v2106_v33 = vmul.f32 %v2101_v18, %v2776_v45 }
 0x486   : > { %v2110_v24 = vpop.permute.xlu1 %2109 }
 0x487   : > { %v2112_v14 = vadd.f32 %v2110_v24, %v2103_v25  ;;  %v2113_v37 = vadd.f32 %v2110_v24, %v2104_v26  ;;  %v2114_v34 = vadd.f32 %v2110_v24, %v2105_v27  ;;  %v2115_v16 = vadd.f32 %v2110_v24, %v2106_v33 }
 0x4ed   : > { %v2204_v28 = vpop.permute.xlu0 %2203 }
 0x4ee   : > { %v2206_v29 = vadd.f32 %v2204_v28, %v2197_v20  ;;  %v2207_v30 = vadd.f32 %v2204_v28, %v2198_v21  ;;  %v2208_v31 = vadd.f32 %v2204_v28, %v2199_v22  ;;  %v2209_v32 = vadd.f32 %v2204_v28, %v2200_v23 }
 0x4f0   : > { %v2210_v35 = vmax.f32 %v2206_v29, 0.0  ;;  %v2211_v36 = vmax.f32 %v2207_v30, 0.0  ;;  %v2212_v13 = vmax.f32 %v2208_v31, 0.0  ;;  %v2213_v38 = vmax.f32 %v2209_v32, 0.0 }
 0x4f2   : > { %v2214_v12 = vadd.f32 %v2210_v35, %v2112_v14  ;;  %v2215_v39 = vadd.f32 %v2211_v36, %v2113_v37  ;;  %v2216_v44 = vadd.f32 %v2212_v13, %v2114_v34  ;;  %v2217_v15 = vadd.f32 %v2213_v38, %v2115_v16 }
 0x4f4   : > { %v2218_v42 = vadd.f32 %v2215_v39, %v2214_v12  ;;  %v2224_v40 = vmul.f32 %v2214_v12, %v2214_v12  ;;  %v2225_v41 = vmul.f32 %v2215_v39, %v2215_v39  ;;  %v2226_v46 = vmul.f32 %v2216_v44, %v2216_v44 }
 0x4f5   : > { %v2227_v45 = vmul.f32 %v2217_v15, %v2217_v15 }
 0x4f6   : > { %v2219_v43 = vadd.f32 %v2218_v42, %v2216_v44  ;;  %v2228_v8 = vadd.f32 %v2225_v41, %v2224_v40 }
 0x4f8   : > { %v2220_v47 = vadd.f32 %v2219_v43, %v2217_v15  ;;  %v2229_v48 = vadd.f32 %v2228_v8, %v2226_v46 }
 0x4fa   : > { %2221 = vadd.xlane.f32.xlu1 %v2220_v47  ;;  %v2230_v49 = vadd.f32 %v2229_v48, %v2227_v45 }
 0x4fc   : > { %2231 = vadd.xlane.f32.xlu0 %v2230_v49 }
 0x587   : > { %v2222_v50 = vpop.xlane.xlu1 %2221 }
 0x588   : > { %v2223_v51 = vmul.f32 0.001953125, %v2222_v50 }
 0x589   : > { %v2232_v52 = vpop.xlane.xlu0 %2231 }
 0x58a   : > { %v2234_v53 = vmul.f32 %v2223_v51, %v2223_v51  ;;  %v2233_v54 = vmul.f32 0.001953125, %v2232_v52 }
 0x58c   : > { %v2235_v55 = vsub.f32 %v2233_v54, %v2234_v53 }
 0x58e   : > { %v2236_v56 = vadd.f32 1e-05, %v2235_v55 }
 0x590   : > { %2444 = vrsqrt.f32 %v2236_v56 }
 0x59a   : > { %v2445_v57 = vpop.eup %2444 }
 0x59b   : > { %v2238_v58 = vmul.f32 %v2445_v57, %v2789_v19 }
 0x59d   : > { %2247 = vperm.xlu1 %2436, %v2238_v58   ;;  %v2239_v59 = vmul.f32 %v2238_v58, %v2223_v51 }
 0x59f   : > { %2241 = vrot.lane.b32.xlu0 %v2239_v59, %s2458_s20 }
 0x5a1   : > { %2437 = vset.pattern.permute.xlu1 %v2466_v1 }
 0x611   : > { %v2242_v60 = vpop.permute.xlu0 %2241 }
 0x612   : > { %v2244_v61 = vsub.f32 %v2789_v19, %v2242_v60 }
 0x614   : > { %2256 = vperm.xlu1 %2437, %v2244_v61  }
 0x61c   : > { %v2248_v62 = vpop.permute.xlu1 %2247 }
 0x61d   : > { %v2250_v63 = vmul.f32 %v2248_v62, %v2214_v12  ;;  %v2251_v0 = vmul.f32 %v2248_v62, %v2215_v39  ;;  %v2252_v2 = vmul.f32 %v2248_v62, %v2216_v44  ;;  %v2253_v3 = vmul.f32 %v2248_v62, %v2217_v15 }
 0x690   : > { %2270 = sbr.rel (%p2370_p5) target bundleno = 1690 (0x69a), region = 48 }
 0x693   : > { %v2257_v4 = vpop.permute.xlu1 %2256 }
 0x694   : > { %v2259_v5 = vadd.f32 %v2257_v4, %v2250_v63  ;;  %v2260_v6 = vadd.f32 %v2257_v4, %v2251_v0  ;;  %v2261_v7 = vadd.f32 %v2257_v4, %v2252_v2  ;;  %v2262_v9 = vadd.f32 %v2257_v4, %v2253_v3 }
 0x696   : > { %v2263_v10 = vmax.f32 %v2259_v5, 0.0  ;;  %v2264_v11 = vmax.f32 %v2260_v6, 0.0  ;;  %v2265_v17 = vmax.f32 %v2261_v7, 0.0  ;;  %v2266_v18 = vmax.f32 %v2262_v9, 0.0 }
 0x698   : > { %2271 = vst [vmem:[#allocation2] sm:$0xff] %v2263_v10  ;;  %2272 = vst [vmem:[#allocation2 + $0x8] sm:$0xff] %v2264_v11 }
 0x699   : > { %2273 = vst [vmem:[#allocation2 + $0x10] sm:$0xff] %v2265_v17  ;;  %2274 = vst [vmem:[#allocation2 + $0x18] sm:$0xff] %v2266_v18 }
 0x69a PF: > { %p2371_p6 = scmp.ne.s32.totalorder %s2505_s19, 1 }
 0x69b   : > { %2279 = vst [vmem:[%s2831_s5] sm:$0xff] (!%p2371_p6), %v2263_v10  ;;  %2280 = vst [vmem:[%s2831_s5 + $0x8] sm:$0xff] (!%p2371_p6), %v2264_v11 }
 0x69c   : > { %2278 = sbr.rel (%p2371_p6) target bundleno = 1699 (0x6a3), region = 52  ;;  %2281 = vst [vmem:[%s2831_s5 + $0x10] sm:$0xff] (!%p2371_p6), %v2265_v17  ;;  %2282 = vst [vmem:[%s2831_s5 + $0x18] sm:$0xff] (!%p2371_p6), %v2266_v18 }
 0x6a3 PF: > { %s15_s18 = sadd.s32 1, %s2452_s18  }
 0x6a4   : > { %p12_p7 = scmp.ge.s32.totalorder %s15_s18, 4  }
 0x6a6   :  { %14 = sbr.rel (!%p12_p7) target bundleno = 1 (0x1), region = 91 }

</bundles_post_ra>
